<compile_context>
chip_gen: v5e
topology: v5e:2x2
jax: 0.10.0
libtpu: 0.0.40
codegen_flags: <defaults>
</compile_context>

<pallas_src>
import math
import functools

import jax
import jax.numpy as jnp
from jax import lax
from jax.experimental import pallas as pl
from jax.experimental.pallas import tpu as pltpu


_VMEM_LIMIT = 32 * 1024 * 1024  # explicit scoped-VMEM budget; safe on v5e/v6e/v7x


def _choose_tile(dim, target, align):
    """Largest legal tile: full dim if small, else an `align`-multiple divisor <= target."""
    if dim <= target:
        return dim
    t = (target // align) * align
    while t >= align:
        if dim % t == 0:
            return t
        t -= align
    return dim  # fall back to the whole (un-tiled) dimension


# ---------------------------------------------------------------------------
# Tiled linear projection: y = x @ w + b   (used for the K / V projections)
# ---------------------------------------------------------------------------
def linear_kernel(x_ref, w_ref, b_ref, o_ref, acc_ref, *, compute_dtype):
    @pl.when(pl.program_id(2) == 0)
    def _init():
        acc_ref[...] = jnp.zeros_like(acc_ref)

    acc_ref[...] += jnp.dot(
        x_ref[...].astype(compute_dtype),
        w_ref[...].astype(compute_dtype),
        preferred_element_type=jnp.float32,
    )

    @pl.when(pl.program_id(2) == pl.num_programs(2) - 1)
    def _finalize():
        # bias added exactly once (last K step), broadcast once per (i, j) tile
        o_ref[...] = (acc_ref[...] + b_ref[...]).astype(o_ref.dtype)


def linear(x, w, b, *, out_dtype, compute_dtype=jnp.float32,
           tm_target=256, tn_target=256, tk_target=512):
    """y = x @ w + b with (tm, tn, tk) tiling and an f32 accumulator."""
    M, K = x.shape
    Kw, N = w.shape
    assert K == Kw
    tm = _choose_tile(M, tm_target, 8)
    tn = _choose_tile(N, tn_target, 128)
    tk = _choose_tile(K, tk_target, 128)
    grid = (M // tm, N // tn, K // tk)

    kern = functools.partial(linear_kernel, compute_dtype=compute_dtype)
    itemsize = jnp.dtype(x.dtype).itemsize
    return pl.pallas_call(
        kern,
        out_shape=jax.ShapeDtypeStruct((M, N), out_dtype),
        grid=grid,
        in_specs=[
            pl.BlockSpec((tm, tk), lambda i, j, k: (i, k)),
            pl.BlockSpec((tk, tn), lambda i, j, k: (k, j)),
            pl.BlockSpec((1, tn), lambda i, j, k: (0, j)),
        ],
        out_specs=pl.BlockSpec((tm, tn), lambda i, j, k: (i, j)),
        scratch_shapes=[pltpu.VMEM((tm, tn), jnp.float32)],
        compiler_params=pltpu.CompilerParams(
            dimension_semantics=("parallel", "parallel", "arbitrary"),
            vmem_limit_bytes=_VMEM_LIMIT,
        ),
        cost_estimate=pl.CostEstimate(
            flops=2 * M * N * K,
            transcendentals=0,
            bytes_accessed=(M * K + K * N) * itemsize + (M * N + N) * 4,
        ),
    )(x, w, b.reshape(1, N).astype(jnp.float32))


# ---------------------------------------------------------------------------
# Fused Q-proj + multi-head attention + out-proj: one program per (batch, tgt-tile)
# ---------------------------------------------------------------------------
def _fused_attn_body(query, wq, bq, k, v, wo, bo, o_ref, w_ref, *,
                     num_heads, approx, compute_dtype):
    # query: (tq, E) raw query   wq/wo: (E, E) compute_dtype   bq/bo: (1, E) f32
    # k, v: (S, E) compute_dtype.  Scaling is folded into wq/bq on the host.
    tq, E = query.shape
    D = E // num_heads

    # Q projection in VMEM (f32 accumulate), already scaled.
    q = jnp.dot(query.astype(compute_dtype), wq,
                preferred_element_type=jnp.float32) + bq
    q = q.astype(compute_dtype)                      # (tq, E)

    ctx_heads = []
    for h in range(num_heads):                       # static unroll over heads
        qh = q[:, h * D:(h + 1) * D]                 # (tq, D)
        kh = k[:, h * D:(h + 1) * D]                 # (S, D)
        vh = v[:, h * D:(h + 1) * D]                 # (S, D)

        # contraction over the last dim of both operands -> no in-kernel k.T
        s = lax.dot_general(
            qh, kh, dimension_numbers=(((1,), (1,)), ((), ())),
            preferred_element_type=jnp.float32,
        )                                            # (tq, S) f32 pre-softmax scores
        w_ref[0, h] = s                              # attn_weights output (module contract)

        m = jnp.max(s, axis=-1, keepdims=True)
        p = jnp.exp(s - m)                           # f32 softmax numerator
        l = jnp.sum(p, axis=-1, keepdims=True)
        ctx = jnp.dot(p.astype(vh.dtype), vh,
                      preferred_element_type=jnp.float32)   # (tq, D)
        # deferred normalization: scale the (tq, D) context, not the (tq, S) probs
        ctx_heads.append(ctx * pl.reciprocal(l, approx=approx))
        # TODO(synk): dropout on attn_probs (eval-mode no-op here)

    ctx = jnp.concatenate(ctx_heads, axis=-1).astype(compute_dtype)      # (tq, E)

    # Out projection fused in VMEM: no HBM roundtrip for the merged context.
    out = jnp.dot(ctx, wo, preferred_element_type=jnp.float32) + bo
    o_ref[0] = out.astype(o_ref.dtype)               # lane-dense (tq, E) store


def fused_attn_kernel_split(query_ref, wq_ref, bq_ref, k_ref, v_ref, wo_ref, bo_ref,
                            o_ref, w_ref, *, num_heads, approx, compute_dtype):
    _fused_attn_body(query_ref[0], wq_ref[...], bq_ref[...], k_ref[0], v_ref[0],
                     wo_ref[...], bo_ref[...], o_ref, w_ref,
                     num_heads=num_heads, approx=approx, compute_dtype=compute_dtype)


def fused_attn_kernel_packed(query_ref, wq_ref, bq_ref, kv_ref, wo_ref, bo_ref,
                             o_ref, w_ref, *, num_heads, approx, compute_dtype):
    E = query_ref.shape[-1]
    kv = kv_ref[0]                                   # (S, 2E): columns [K | V]
    _fused_attn_body(query_ref[0], wq_ref[...], bq_ref[...], kv[:, :E], kv[:, E:],
                     wo_ref[...], bo_ref[...], o_ref, w_ref,
                     num_heads=num_heads, approx=approx, compute_dtype=compute_dtype)


def fused_attention(query, wq, bq, k_or_kv, v, wo, bo, num_heads, *,
                    fused_kv, out_dtype, compute_dtype, t_block=256):
    """query: (B, T, E) raw.  If fused_kv: k_or_kv is (B, S, 2E) packed [K|V]; else k, v: (B, S, E)."""
    B, T, E = query.shape
    S = k_or_kv.shape[1]
    H = num_heads
    D = E // H
    tq = _choose_tile(T, t_block, 8)
    approx = compute_dtype != jnp.float32            # exact reciprocal on the f32 path

    front_specs = [
        pl.BlockSpec((1, tq, E), lambda b, t: (b, t, 0)),   # query tile
        pl.BlockSpec((E, E), lambda b, t: (0, 0)),          # W_q (resident across grid)
        pl.BlockSpec((1, E), lambda b, t: (0, 0)),          # b_q
    ]
    tail_specs = [
        pl.BlockSpec((E, E), lambda b, t: (0, 0)),          # W_out (resident across grid)
        pl.BlockSpec((1, E), lambda b, t: (0, 0)),          # b_out
    ]
    if fused_kv:
        kern = functools.partial(fused_attn_kernel_packed, num_heads=H,
                                 approx=approx, compute_dtype=compute_dtype)
        kv_specs = [pl.BlockSpec((1, S, 2 * E), lambda b, t: (b, 0, 0))]
        inputs = (query, wq, bq, k_or_kv, wo, bo)
    else:
        kern = functools.partial(fused_attn_kernel_split, num_heads=H,
                                 approx=approx, compute_dtype=compute_dtype)
        kv_specs = [pl.BlockSpec((1, S, E), lambda b, t: (b, 0, 0)),
                    pl.BlockSpec((1, S, E), lambda b, t: (b, 0, 0))]
        inputs = (query, wq, bq, k_or_kv, v, wo, bo)

    itemsize = jnp.dtype(compute_dtype).itemsize
    return pl.pallas_call(
        kern,
        out_shape=(
            jax.ShapeDtypeStruct((B, T, E), out_dtype),       # final output (after out_proj)
            jax.ShapeDtypeStruct((B, H, T, S), jnp.float32),  # pre-softmax weights
        ),
        grid=(B, T // tq),
        in_specs=front_specs + kv_specs + tail_specs,
        out_specs=(
            pl.BlockSpec((1, tq, E), lambda b, t: (b, t, 0)),
            pl.BlockSpec((1, H, tq, S), lambda b, t: (b, 0, t, 0)),
        ),
        compiler_params=pltpu.CompilerParams(
            dimension_semantics=("parallel", "parallel"),
            vmem_limit_bytes=_VMEM_LIMIT,
        ),
        cost_estimate=pl.CostEstimate(
            flops=4 * B * T * E * E + 4 * B * H * T * S * D,
            transcendentals=B * H * T * S,
            bytes_accessed=(B * T * E + 2 * B * S * E + 2 * E * E) * itemsize
                           + (B * T * E + B * H * T * S + 2 * E) * 4,
        ),
    )(*inputs)


# ---------------------------------------------------------------------------
# Parameters + module-level forward
# ---------------------------------------------------------------------------
def init_params(key, embed_dim):
    """nn.Linear-shaped params; weights stored (in, out) so kernels compute x @ w + b."""
    keys = jax.random.split(key, 8)
    bound = 1.0 / math.sqrt(embed_dim)

    def lin(kw, kb):
        w = jax.random.uniform(kw, (embed_dim, embed_dim), jnp.float32, -bound, bound)
        b = jax.random.uniform(kb, (embed_dim,), jnp.float32, -bound, bound)
        return w, b

    return {
        "q": lin(keys[0], keys[1]),
        "k": lin(keys[2], keys[3]),
        "v": lin(keys[4], keys[5]),
        "out": lin(keys[6], keys[7]),
    }


def cross_multihead_attention(params, query, key, value, num_heads,
                              key_padding_mask=None, attn_bias=None,
                              scaling_factor=1, compute_dtype=jnp.bfloat16):
    assert key_padding_mask is None and attn_bias is None, \
        "TODO(synk): key_padding_mask / attn_bias not implemented"
    bsz, tgt_len, embed_dim = query.shape
    src_len = key.shape[1]
    head_dim = embed_dim // num_heads
    assert head_dim * num_heads == embed_dim
    scaling = (head_dim * scaling_factor) ** (-0.5)
    out_dtype = query.dtype

    # Scaling folded into W_q / b_q on the host: q_scaled = query @ (Wq*s) + (bq*s),
    # mathematically identical to PyTorch's post-projection q * scaling.
    wq = (params["q"][0] * scaling).astype(compute_dtype)
    bq = (params["q"][1] * scaling).reshape(1, embed_dim).astype(jnp.float32)
    wo = params["out"][0].astype(compute_dtype)
    bo = params["out"][1].reshape(1, embed_dim).astype(jnp.float32)

    fused_kv = key is value
    if fused_kv:
        # Fused K/V projection: single pass over the shared (B*S, E) activation, wide N=2E.
        w_kv = jnp.concatenate([params["k"][0], params["v"][0]], axis=1)   # (E, 2E)
        b_kv = jnp.concatenate([params["k"][1], params["v"][1]], axis=0)   # (2E,)
        kv = linear(key.reshape(bsz * src_len, embed_dim), w_kv, b_kv,
                    out_dtype=compute_dtype, compute_dtype=compute_dtype)
        kv = kv.reshape(bsz, src_len, 2 * embed_dim)
        out, attn_w = fused_attention(query, wq, bq, kv, None, wo, bo, num_heads,
                                      fused_kv=True, out_dtype=out_dtype,
                                      compute_dtype=compute_dtype)
    else:
        k = linear(key.reshape(bsz * src_len, embed_dim), *params["k"],
                   out_dtype=compute_dtype, compute_dtype=compute_dtype)
        v = linear(value.reshape(bsz * src_len, embed_dim), *params["v"],
                   out_dtype=compute_dtype, compute_dtype=compute_dtype)
        k = k.reshape(bsz, src_len, embed_dim)
        v = v.reshape(bsz, src_len, embed_dim)
        out, attn_w = fused_attention(query, wq, bq, k, v, wo, bo, num_heads,
                                      fused_kv=False, out_dtype=out_dtype,
                                      compute_dtype=compute_dtype)

    attn_w = attn_w.reshape(bsz * num_heads, tgt_len, src_len)   # free reshape
    return out, attn_w


# ---------------------------------------------------------------------------
# Pure-JAX reference
# ---------------------------------------------------------------------------
def reference(params, query, key, value, num_heads, scaling_factor=1):
    bsz, tgt_len, embed_dim = query.shape
    src_len = key.shape[1]
    head_dim = embed_dim // num_heads
    scaling = (head_dim * scaling_factor) ** (-0.5)

    q = query @ params["q"][0] + params["q"][1]
    k = key @ params["k"][0] + params["k"][1]
    v = value @ params["v"][0] + params["v"][1]

    def split(x, L):
        return (x.reshape(bsz, L, num_heads, head_dim)
                 .transpose(0, 2, 1, 3)
                 .reshape(bsz * num_heads, L, head_dim))

    qh = split(q, tgt_len) * scaling
    kh = split(k, src_len)
    vh = split(v, src_len)
    w = jnp.einsum("btd,bsd->bts", qh, kh)
    p = jax.nn.softmax(w, axis=-1)
    a = jnp.einsum("bts,bsd->btd", p, vh)
    a = (a.reshape(bsz, num_heads, tgt_len, head_dim)
          .transpose(0, 2, 1, 3)
          .reshape(bsz, tgt_len, embed_dim))
    out = a @ params["out"][0] + params["out"][1]
    return out, w


# ---------------------------------------------------------------------------
if __name__ == "__main__":
    embed_dim = 32
    num_heads = 4
    bsz = 2
    tgt_len = 8
    src_len = 16

    root = jax.random.PRNGKey(0)
    kp, kq, kk, kv = jax.random.split(root, 4)
    params = init_params(kp, embed_dim)

    query = jax.random.normal(kq, (bsz, tgt_len, embed_dim), jnp.float32)
    key = jax.random.normal(kk, (bsz, src_len, embed_dim), jnp.float32)
    value = jax.random.normal(kv, (bsz, src_len, embed_dim), jnp.float32)

    # 1) f32 compute path, distinct key/value tensors (separate K/V projection kernels).
    out, attn_w = cross_multihead_attention(params, query, key, value, num_heads,
                                            compute_dtype=jnp.float32)
    out = jax.block_until_ready(out)
    attn_w = jax.block_until_ready(attn_w)
    ref_out, ref_w = reference(params, query, key, value, num_heads)
    assert out.shape == (bsz, tgt_len, embed_dim)
    assert attn_w.shape == (bsz * num_heads, tgt_len, src_len)
    assert jnp.allclose(out, ref_out, atol=1e-3, rtol=1e-3)
    assert jnp.allclose(attn_w, ref_w, atol=1e-3, rtol=1e-3)

    # 2) bf16 MXU path with key-is-value (fused K/V projection + packed-KV attention kernel).
    out2, attn_w2 = cross_multihead_attention(params, query, key, key, num_heads,
                                              compute_dtype=jnp.bfloat16)
    out2 = jax.block_until_ready(out2)
    attn_w2 = jax.block_until_ready(attn_w2)
    ref_out2, ref_w2 = reference(params, query, key, key, num_heads)
    assert out2.shape == (bsz, tgt_len, embed_dim)
    assert attn_w2.shape == (bsz * num_heads, tgt_len, src_len)
    assert jnp.allclose(out2.astype(jnp.float32), ref_out2, atol=7e-2, rtol=7e-2)
    assert jnp.allclose(attn_w2, ref_w2, atol=7e-2, rtol=7e-2)

    print("KERNEL_OK")
</pallas_src>

<mosaic_0001>
module attributes {stable_mosaic.version = 11 : i64} {
  func.func @linear_kernel(%arg0: i32, %arg1: i32, %arg2: i32, %arg3: memref<32x32xf32, #tpu.memory_space<vmem>>, %arg4: memref<32x32xf32, #tpu.memory_space<vmem>>, %arg5: memref<1x32xf32, #tpu.memory_space<vmem>>, %arg6: memref<32x32xf32, #tpu.memory_space<vmem>>, %arg7: memref<32x32xf32, #tpu.memory_space<vmem>>) attributes {dimension_semantics = [#tpu.dimension_semantics<parallel>, #tpu.dimension_semantics<parallel>, #tpu.dimension_semantics<arbitrary>], iteration_bounds = array<i64: 1, 1, 1>, scalar_prefetch = 0 : i64, scratch_operands = 1 : i64, tpu.core_type = #tpu.core_type<tc>, window_params = [{transform_indices = @transform_0, window_bounds = array<i64: 32, 32>}, {transform_indices = @transform_1, window_bounds = array<i64: 32, 32>}, {transform_indices = @transform_2, window_bounds = array<i64: 1, 32>}, {transform_indices = @transform_3, window_bounds = array<i64: 32, 32>}]} {
    %c0_i32 = arith.constant 0 : i32
    %0 = arith.cmpi eq, %arg2, %c0_i32 : i32
    %1 = arith.extui %0 : i1 to i32
    %c0_i32_0 = arith.constant 0 : i32
    %2 = arith.cmpi ne, %1, %c0_i32_0 : i32
    scf.if %2 {
      %cst_10 = arith.constant 0.000000e+00 : f32
      %12 = vector.broadcast %cst_10 : f32 to vector<32x32xf32>
      %c0_11 = arith.constant 0 : index
      %c0_12 = arith.constant 0 : index
      %13 = vector.load %arg7[%c0_11, %c0_12] : memref<32x32xf32, #tpu.memory_space<vmem>>, vector<32x32xf32>
      tpu.vector_store %arg7[%c0_11, %c0_12], %12 {strides = array<i32>} : memref<32x32xf32, #tpu.memory_space<vmem>>, vector<32x32xf32>,
    } else {
    }
    %c0 = arith.constant 0 : index
    %c0_1 = arith.constant 0 : index
    %3 = vector.load %arg7[%c0, %c0_1] : memref<32x32xf32, #tpu.memory_space<vmem>>, vector<32x32xf32>
    %c0_2 = arith.constant 0 : index
    %c0_3 = arith.constant 0 : index
    %4 = vector.load %arg3[%c0_2, %c0_3] : memref<32x32xf32, #tpu.memory_space<vmem>>, vector<32x32xf32>
    %c0_4 = arith.constant 0 : index
    %c0_5 = arith.constant 0 : index
    %5 = vector.load %arg4[%c0_4, %c0_5] : memref<32x32xf32, #tpu.memory_space<vmem>>, vector<32x32xf32>
    %cst = arith.constant dense<0.000000e+00> : vector<32x32xf32>
    %6 = tpu.matmul %4, %5, %cst {dimension_numbers = #tpu.dot_dimension_numbers<[1], [0], [0], [1], [0, 0, 1, 1], [], []>} : vector<32x32xf32>, vector<32x32xf32>, vector<32x32xf32> -> vector<32x32xf32>
    %7 = arith.addf %3, %6 : vector<32x32xf32>
    %c0_6 = arith.constant 0 : index
    %c0_7 = arith.constant 0 : index
    %8 = vector.load %arg7[%c0_6, %c0_7] : memref<32x32xf32, #tpu.memory_space<vmem>>, vector<32x32xf32>
    tpu.vector_store %arg7[%c0_6, %c0_7], %7 {strides = array<i32>} : memref<32x32xf32, #tpu.memory_space<vmem>>, vector<32x32xf32>,
    %c0_i32_8 = arith.constant 0 : i32
    %9 = arith.cmpi eq, %arg2, %c0_i32_8 : i32
    %10 = arith.extui %9 : i1 to i32
    %c0_i32_9 = arith.constant 0 : i32
    %11 = arith.cmpi ne, %10, %c0_i32_9 : i32
    scf.if %11 {
      %c0_10 = arith.constant 0 : index
      %c0_11 = arith.constant 0 : index
      %12 = vector.load %arg7[%c0_10, %c0_11] : memref<32x32xf32, #tpu.memory_space<vmem>>, vector<32x32xf32>
      %c0_12 = arith.constant 0 : index
      %c0_13 = arith.constant 0 : index
      %13 = vector.load %arg5[%c0_12, %c0_13] : memref<1x32xf32, #tpu.memory_space<vmem>>, vector<1x32xf32>
      %14 = vector.broadcast %13 : vector<1x32xf32> to vector<32x32xf32>
      %15 = arith.addf %12, %14 : vector<32x32xf32>
      %c0_14 = arith.constant 0 : index
      %c0_15 = arith.constant 0 : index
      %16 = vector.load %arg6[%c0_14, %c0_15] : memref<32x32xf32, #tpu.memory_space<vmem>>, vector<32x32xf32>
      tpu.vector_store %arg6[%c0_14, %c0_15], %15 {strides = array<i32>} : memref<32x32xf32, #tpu.memory_space<vmem>>, vector<32x32xf32>,
    } else {
    }
    return
  }
  func.func @transform_0(%arg0: i32, %arg1: i32, %arg2: i32) -> (i32, i32) {
    %c0_i32 = arith.constant 0 : i32
    return %arg0, %arg2 : i32, i32
  }
  func.func @transform_1(%arg0: i32, %arg1: i32, %arg2: i32) -> (i32, i32) {
    %c0_i32 = arith.constant 0 : i32
    return %arg2, %arg1 : i32, i32
  }
  func.func @transform_2(%arg0: i32, %arg1: i32, %arg2: i32) -> (i32, i32) {
    %c0_i32 = arith.constant 0 : i32
    %c0_i32_0 = arith.constant 0 : i32
    return %c0_i32, %arg1 : i32, i32
  }
  func.func @transform_3(%arg0: i32, %arg1: i32, %arg2: i32) -> (i32, i32) {
    %c0_i32 = arith.constant 0 : i32
    return %arg0, %arg1 : i32, i32
  }
}

</mosaic_0001>

<bundles_post_ra>
// kernel: tpu_custom_call.1
= control target key start
LH: loop header
LB: loop body
LE: loop exit
PB: predicated region body
PF: predicated region fallthrough
CT: control target
= control target key end

     0   :  { %8 = vsyncpa [#allocation4], 0  ;;  %s321_s0 = inlined_call_operand.hbm [shape: f32[32,32], index: 0, kind: input, shape index: {}]   ;;  %s322_s1 = inlined_call_operand.hbm [shape: f32[32,32], index: 1, kind: input, shape index: {}]   ;;  %s323_s2 = inlined_call_operand.vmem [shape: f32[1,32], index: 2, kind: input, shape index: {}]   ;;  %s324_s3 = inlined_call_operand.hbm [shape: f32[32,32], index: 3, kind: output, shape index: {}]  }
   0x1   :  { %9 = vsyncpa [#allocation7], 0 }
   0x2   :  { %10 = vsyncpa [#allocation5], 0  ;;  %s15_s14 = sshll.u32 %s321_s0, 4  ;;  %s258_s15 = smov [#allocation3]   ;;  %s16_s14 = int_to_ptr.hbm [resolvable:$true] %s15_s14 }
   0x3   :  { %s17_s16 = sshll.u32 %s258_s15, 4  ;;  %s28_s19 = sshll.u32 %s322_s1, 4  ;;  %s18_s16 = int_to_ptr.vmem [resolvable:$true] %s17_s16  ;;  %s29_s19 = int_to_ptr.hbm [resolvable:$true] %s28_s19 }
   0x4   :  { %s259_s20 = smov 128   ;;  %s260_s21 = smov 8  }
   0x5   :  { %23 = dma.hbm_to_vmem [thread:$0]  %s16_s14, 512, %s18_s16, [#allocation4], %s259_s20, %s259_s20, %s260_s21  }
   0x6   :  { %s261_s22 = smov [#allocation6]  }
   0x7   :  { %s30_s23 = sshll.u32 %s261_s22, 4  ;;  %s31_s23 = int_to_ptr.vmem [resolvable:$true] %s30_s23 }
   0x8   :  { %36 = dma.hbm_to_vmem [thread:$0]  %s29_s19, 512, %s31_s23, [#allocation7], %s259_s20, %s259_s20, %s260_s21  }
   0x9   :  { %252 = dma.done.wait [#allocation4], 512  }
   0xa   :  { %253 = vsyncadd [#allocation4], 4294966784 }
   0xb   :  { %254 = dma.done.wait [#allocation7], 512  }
   0xc   :  { %255 = vsyncadd [#allocation7], 4294966784  ;;  %vm51_vm0 = vcmask 261120   ;;  %v262_v0 = vmov 0.0   ;;  %v67_v1 = vld [vmem:[#allocation6 + $0x18] sm:$0xff]  ;;  %v66_v2 = vld [vmem:[#allocation6 + $0x10] sm:$0xff] }
   0xd   :  { %52 = vst.msk [vmem:[#allocation2] sm:$0xff] %vm51_vm0, %v262_v0  ;;  %162 = vmatpush.msra.mxu2 %v67_v1  ;;  %163 = vmatpush.msra.mxu3 %v67_v1  ;;  %v65_v3 = vld [vmem:[#allocation6 + $0x8] sm:$0xff]  ;;  %v64_v4 = vld [vmem:[#allocation6] sm:$0xff]  ;;  %v62_v5 = vld [vmem:[#allocation3 + $0x10] sm:$0xff]  ;;  %s263_s24 = smov [#allocation8]   ;;  %s143_s28 = sshll.u32 %s324_s3, 4  ;;  %s144_s28 = int_to_ptr.hbm [resolvable:$true] %s143_s28 }
   0xe   :  { %53 = vst.msk [vmem:[#allocation2 + $0x8] sm:$0xff] %vm51_vm0, %v262_v0  ;;  %93 = vmatpush.msra.mxu0 %v67_v1  ;;  %161 = vmatpush.msra.mxu1 %v67_v1  ;;  %v63_v6 = vld [vmem:[#allocation3 + $0x18] sm:$0xff]  ;;  %v60_v7 = vld [vmem:[#allocation3] sm:$0xff]  ;;  %v61_v8 = vld [vmem:[#allocation3 + $0x8] sm:$0xff]  ;;  %s141_s25 = sshll.u32 %s263_s24, 4  ;;  %s142_s25 = int_to_ptr.vmem [resolvable:$true] %s141_s25 }
   0xf   :  { %54 = vst.msk [vmem:[#allocation2 + $0x10] sm:$0xff] %vm51_vm0, %v262_v0  ;;  %165 = vmatpush.msra.mxu2 %v66_v2  ;;  %166 = vmatpush.msra.mxu3 %v66_v2  ;;  %v179_v21 = vld [vmem:[%s323_s2] ss:$0 sm:$0xff] }
  0x10   :  { %55 = vst.msk [vmem:[#allocation2 + $0x18] sm:$0xff] %vm51_vm0, %v262_v0  ;;  %94 = vmatpush.msra.mxu0 %v66_v2  ;;  %164 = vmatpush.msra.mxu1 %v66_v2 }
  0x11   :  { %168 = vmatpush.msra.mxu2 %v65_v3  ;;  %169 = vmatpush.msra.mxu3 %v65_v3 }
  0x12   :  { %95 = vmatpush.msra.mxu0 %v65_v3  ;;  %167 = vmatpush.msra.mxu1 %v65_v3 }
  0x13   :  { %171 = vmatpush.msra.mxu2 %v64_v4  ;;  %172 = vmatpush.msra.mxu3 %v64_v4 }
  0x14   :  { %159 = vmatmul.msk.f32.vlgmr.msra.gmra.mxu2 %vm51_vm0, %v62_v5  ;;  %160 = vmatmul.msk.f32.vlgmr.msra.gmra.mxu3 %vm51_vm0, %v63_v6  ;;  %v56_v9 = vld [vmem:[#allocation2] sm:$0xff] }
  0x15   :  { %96 = vmatpush.msra.mxu0 %v64_v4  ;;  %170 = vmatpush.msra.mxu1 %v64_v4  ;;  %v57_v10 = vld [vmem:[#allocation2 + $0x8] sm:$0xff] }
  0x16   :  { %157 = vmatmul.msk.f32.vlgmr.msra.gmra.mxu0 %vm51_vm0, %v60_v7  ;;  %158 = vmatmul.msk.f32.vlgmr.msra.gmra.mxu1 %vm51_vm0, %v61_v8  ;;  %v58_v15 = vld [vmem:[#allocation2 + $0x10] sm:$0xff] }
  0x17   :  { %v59_v16 = vld [vmem:[#allocation2 + $0x18] sm:$0xff] }
  0x93   :  { %v98_v11 = vpop.f32.mrf.mxu0  ;;  %v101_v12 = vpop.f32.mrf.mxu1 }
  0x94   :  { %v110_v13 = vadd.f32 %v98_v11, %v56_v9  ;;  %v111_v14 = vadd.f32 %v101_v12, %v57_v10 }
  0x96   :  { %114 = vst.msk [vmem:[#allocation2] sm:$0xff] %vm51_vm0, %v110_v13 }
  0x97   :  { %115 = vst.msk [vmem:[#allocation2 + $0x8] sm:$0xff] %vm51_vm0, %v111_v14  ;;  %v104_v17 = vpop.f32.mrf.mxu2  ;;  %v107_v18 = vpop.f32.mrf.mxu3 }
  0x98   :  { %v112_v19 = vadd.f32 %v104_v17, %v58_v15  ;;  %v113_v20 = vadd.f32 %v107_v18, %v59_v16 }
  0x9a   :  { %116 = vst.msk [vmem:[#allocation2 + $0x10] sm:$0xff] %vm51_vm0, %v112_v19 }
  0x9b   :  { %117 = vst.msk [vmem:[#allocation2 + $0x18] sm:$0xff] %vm51_vm0, %v113_v20 }
  0x9d   :  { %v121_v22 = vld [vmem:[#allocation2] sm:$0xff] }
  0x9e   :  { %v122_v23 = vld [vmem:[#allocation2 + $0x8] sm:$0xff]  ;;  %v129_v24 = vadd.f32 %v179_v21, %v121_v22 }
  0x9f   :  { %v130_v25 = vadd.f32 %v179_v21, %v122_v23 }
  0xa0   :  { %133 = vst.msk [vmem:[#allocation8] sm:$0xff] %vm51_vm0, %v129_v24 }
  0xa1   :  { %v123_v26 = vld [vmem:[#allocation2 + $0x10] sm:$0xff]  ;;  %134 = vst.msk [vmem:[#allocation8 + $0x8] sm:$0xff] %vm51_vm0, %v130_v25 }
  0xa2   :  { %v124_v27 = vld [vmem:[#allocation2 + $0x18] sm:$0xff]  ;;  %v131_v28 = vadd.f32 %v179_v21, %v123_v26 }
  0xa3   :  { %v132_v29 = vadd.f32 %v179_v21, %v124_v27 }
  0xa4   :  { %135 = vst.msk [vmem:[#allocation8 + $0x10] sm:$0xff] %vm51_vm0, %v131_v28 }
  0xa5   :  { %136 = vst.msk [vmem:[#allocation8 + $0x18] sm:$0xff] %vm51_vm0, %v132_v29 }
  0xa6   :  { %149 = dma.vmem_to_hbm [thread:$0]  %s142_s25, 512, %s144_s28, [#allocation5], %s259_s20, %s259_s20, %s260_s21  }
  0xa7   :  { %256 = dma.done.wait [#allocation5], 512  }
  0xa8   :  { %257 = vsyncadd [#allocation5], 4294966784 }
  0xa9   :  { %154 = vsyncpa [#allocation4], 1 }
  0xaa   :  { %155 = vsyncpa [#allocation7], 1 }
  0xab   :  { %156 = vsyncpa [#allocation5], 1 }

</bundles_post_ra>
